<compile_context>
chip_gen: v7x
topology: tpu7x:2x2x1
jax: 0.10.0
libtpu: 0.0.40
codegen_flags: <defaults>
</compile_context>

<pallas_src>
import math
from functools import partial

import jax
import jax.numpy as jnp
from jax.experimental import pallas as pl
from jax.experimental.pallas import tpu as pltpu


# ----------------------------- Pallas kernels -----------------------------

def _gcn_block_kernel(w_ref, x_ref, wc_ref, bc_ref, ws_ref, bs_ref,
                      xc_ref, s_ref):
    """Fused per-block kernel: gcn_norm + GCNConv(+ReLU) + pooling-score GCN.

    w_ref : [N, N] raw weighted adjacency (no self loops)
    x_ref : [N, Fin] node features
    wc/bc : conv weight/bias, ws/bs: score weight/bias
    xc_ref: [N, Fout] relu(A_norm @ (X @ Wc) + bc)
    s_ref : [N, 1]    A_norm @ (Xc @ Ws) + bs
    """
    n = w_ref.shape[0]
    a = w_ref[...]
    # A_hat = A + I  (self loops, weight 1)
    row = jax.lax.broadcasted_iota(jnp.int32, (n, n), 0)
    col = jax.lax.broadcasted_iota(jnp.int32, (n, n), 1)
    a = a + jnp.where(row == col, 1.0, 0.0)
    # D^{-1/2} A_hat D^{-1/2}  (row/col degrees are identical for symmetric graphs,
    # matching PyG gcn_norm; computed separately to avoid an in-kernel transpose)
    deg_r = jnp.sum(a, axis=1, keepdims=True)                       # [N, 1]
    deg_c = jnp.sum(a, axis=0, keepdims=True)                       # [1, N]
    dinv_r = jnp.where(deg_r > 0.0, jax.lax.rsqrt(deg_r), 0.0)
    dinv_c = jnp.where(deg_c > 0.0, jax.lax.rsqrt(deg_c), 0.0)
    a_norm = a * dinv_r * dinv_c                                    # normalized ONCE

    # GCNConv + ReLU
    h = jnp.dot(x_ref[...], wc_ref[...], preferred_element_type=jnp.float32)
    xc = jnp.dot(a_norm, h, preferred_element_type=jnp.float32) + bc_ref[...]
    xc = jnp.maximum(xc, 0.0)
    xc_ref[...] = xc

    # pooling-score GCN on the conv output (reuses the resident a_norm)
    s = jnp.dot(xc, ws_ref[...], preferred_element_type=jnp.float32)
    s_ref[...] = jnp.dot(a_norm, s, preferred_element_type=jnp.float32) + bs_ref[...]


def gcn_block(w_raw, x, wc, bc, ws, bs):
    n, fin = x.shape
    fout = wc.shape[1]
    return pl.pallas_call(
        _gcn_block_kernel,
        grid=(1,),
        in_specs=[
            pl.BlockSpec((n, n), lambda i: (0, 0)),
            pl.BlockSpec((n, fin), lambda i: (0, 0)),
            pl.BlockSpec((fin, fout), lambda i: (0, 0)),
            pl.BlockSpec((1, fout), lambda i: (0, 0)),
            pl.BlockSpec((fout, 1), lambda i: (0, 0)),
            pl.BlockSpec((1, 1), lambda i: (0, 0)),
        ],
        out_specs=(
            pl.BlockSpec((n, fout), lambda i: (0, 0)),
            pl.BlockSpec((n, 1), lambda i: (0, 0)),
        ),
        out_shape=(
            jax.ShapeDtypeStruct((n, fout), jnp.float32),
            jax.ShapeDtypeStruct((n, 1), jnp.float32),
        ),
        compiler_params=pltpu.CompilerParams(dimension_semantics=("arbitrary",)),
    )(w_raw, x, wc, bc, ws, bs)


def _readout_kernel(x_ref, o_ref):
    # x_ref: [1, k, F] (one graph per grid step); o_ref: [1, 2F]
    x = x_ref[0]                                   # [k, F]
    k, f = x.shape
    # gmp / gap as segment reductions over the contiguous graph block;
    # two aligned slice stores instead of a lane-dim concatenate.
    o_ref[:, :f] = jnp.max(x, axis=0, keepdims=True)
    o_ref[:, f:] = jnp.sum(x, axis=0, keepdims=True) * (1.0 / k)


def readout(x, num_graphs, k_per_graph):
    n, f = x.shape
    x3d = x.reshape(num_graphs, k_per_graph, f)    # contiguous graphs -> free view
    return pl.pallas_call(
        _readout_kernel,
        grid=(num_graphs,),
        in_specs=[pl.BlockSpec((1, k_per_graph, f), lambda b: (b, 0, 0))],
        out_specs=pl.BlockSpec((1, 2 * f), lambda b: (b, 0)),
        out_shape=jax.ShapeDtypeStruct((num_graphs, 2 * f), jnp.float32),
        compiler_params=pltpu.CompilerParams(dimension_semantics=("parallel",)),
    )(x3d)


def _mlp_head_kernel(x1_ref, x2_ref, x3_ref, w1_ref, b1_ref, w2_ref, b2_ref,
                     w3_ref, b3_ref, label_ref, out_ref, loss_ref):
    # x = x1 + x2 + x3 folded into the head kernel
    x = x1_ref[...] + x2_ref[...] + x3_ref[...]
    h = jnp.dot(x, w1_ref[...], preferred_element_type=jnp.float32) + b1_ref[...]
    h = jnp.maximum(h, 0.0)
    # TODO(synk): dropout is identity here (module evaluated with self.training == False).
    h = jnp.dot(h, w2_ref[...], preferred_element_type=jnp.float32) + b2_ref[...]
    h = jnp.maximum(h, 0.0)
    y = jnp.dot(h, w3_ref[...], preferred_element_type=jnp.float32) + b3_ref[...]
    out_ref[...] = y
    # regression branch -> nn.L1Loss on the pre-softmax logits (log_softmax is unused there)
    loss_ref[...] = jnp.mean(jnp.abs(y - label_ref[...]), keepdims=True)


def mlp_head(x1, x2, x3, params, label):
    b, fin = x1.shape
    h1 = params['lin1_w'].shape[1]
    h2 = params['lin2_w'].shape[1]
    c = params['lin3_w'].shape[1]
    pred, loss = pl.pallas_call(
        _mlp_head_kernel,
        grid=(1,),
        in_specs=[
            pl.BlockSpec((b, fin), lambda i: (0, 0)),
            pl.BlockSpec((b, fin), lambda i: (0, 0)),
            pl.BlockSpec((b, fin), lambda i: (0, 0)),
            pl.BlockSpec((fin, h1), lambda i: (0, 0)),
            pl.BlockSpec((1, h1), lambda i: (0, 0)),
            pl.BlockSpec((h1, h2), lambda i: (0, 0)),
            pl.BlockSpec((1, h2), lambda i: (0, 0)),
            pl.BlockSpec((h2, c), lambda i: (0, 0)),
            pl.BlockSpec((1, c), lambda i: (0, 0)),
            pl.BlockSpec((b, 1), lambda i: (0, 0)),
        ],
        out_specs=(
            pl.BlockSpec((b, c), lambda i: (0, 0)),
            pl.BlockSpec((1, 1), lambda i: (0, 0)),
        ),
        out_shape=(
            jax.ShapeDtypeStruct((b, c), jnp.float32),
            jax.ShapeDtypeStruct((1, 1), jnp.float32),
        ),
        compiler_params=pltpu.CompilerParams(dimension_semantics=("arbitrary",)),
    )(x1, x2, x3, params['lin1_w'], params['lin1_b'], params['lin2_w'], params['lin2_b'],
      params['lin3_w'], params['lin3_b'], label)
    return pred, loss[0, 0]


# ------------------------------ glue (JAX) --------------------------------

def cmp_pool(x, w_raw, score, n_per_graph, ratio):
    # SAGPool-style stand-in for CmP (its source is not provided):
    # per-graph top-k on the (already fused-computed) GCN score -> tanh gating;
    # adjacency is row/col gathered.
    # TODO(synk): CmP's KL term / exact scoring are undefined upstream; KL returned as 0.
    n = x.shape[0]
    b = n // n_per_graph
    s = score[:, 0]
    k = int(math.ceil(ratio * n_per_graph))
    _, idx = jax.lax.top_k(s.reshape(b, n_per_graph), k)              # [B, k]
    perm = (idx + jnp.arange(b)[:, None] * n_per_graph).reshape(-1)   # [B*k]
    gate = jnp.tanh(s[perm])[:, None]
    x_new = x[perm] * gate
    w_new = w_raw[perm][:, perm]
    return x_new, w_new, k, jnp.float32(0.0), perm


def init_params(key, num_features, nhid, num_classes):
    keys = jax.random.split(key, 9)

    def glorot(k, shape):
        lim = math.sqrt(6.0 / (shape[0] + shape[1]))
        return jax.random.uniform(k, shape, jnp.float32, -lim, lim)

    return {
        'conv1_w': glorot(keys[0], (num_features, nhid)), 'conv1_b': jnp.zeros((1, nhid), jnp.float32),
        'conv2_w': glorot(keys[1], (nhid, nhid)),         'conv2_b': jnp.zeros((1, nhid), jnp.float32),
        'conv3_w': glorot(keys[2], (nhid, nhid)),         'conv3_b': jnp.zeros((1, nhid), jnp.float32),
        'pool1_w': glorot(keys[3], (nhid, 1)),            'pool1_b': jnp.zeros((1, 1), jnp.float32),
        'pool2_w': glorot(keys[4], (nhid, 1)),            'pool2_b': jnp.zeros((1, 1), jnp.float32),
        'pool3_w': glorot(keys[5], (nhid, 1)),            'pool3_b': jnp.zeros((1, 1), jnp.float32),
        'lin1_w': glorot(keys[6], (2 * nhid, nhid)),      'lin1_b': jnp.zeros((1, nhid), jnp.float32),
        'lin2_w': glorot(keys[7], (nhid, nhid // 2)),     'lin2_b': jnp.zeros((1, nhid // 2), jnp.float32),
        'lin3_w': glorot(keys[8], (nhid // 2, num_classes)), 'lin3_b': jnp.zeros((1, num_classes), jnp.float32),
        # conv_p (nhid -> 32) is declared in the reference __init__ but never used in forward(); omitted.
    }


def net_forward(params, fea, adj_index, adj_weight, batch_index, label,
                num_graphs, n_per_graph, pooling_ratio):
    del batch_index  # graphs are contiguous by construction; readout uses the layout directly
    n = fea.shape[0]
    label = label[:, 0][:, None]                                      # label[:, 0].unsqueeze(1)

    # dense raw weighted adjacency from COO edges
    w_raw = jnp.zeros((n, n), jnp.float32).at[adj_index[0], adj_index[1]].add(adj_weight)

    # block 1: fused (gcn_norm + conv1 + relu + pool1 score) in one kernel
    xc, score = gcn_block(w_raw, fea, params['conv1_w'], params['conv1_b'],
                          params['pool1_w'], params['pool1_b'])
    x, w_raw, k1, kl1, indices_ = cmp_pool(xc, w_raw, score, n_per_graph, pooling_ratio)
    x1 = readout(x, num_graphs, k1)

    # block 2
    xc, score = gcn_block(w_raw, x, params['conv2_w'], params['conv2_b'],
                          params['pool2_w'], params['pool2_b'])
    x, w_raw, k2, kl2, _ = cmp_pool(xc, w_raw, score, k1, pooling_ratio)
    x2 = readout(x, num_graphs, k2)

    # block 3
    xc, score = gcn_block(w_raw, x, params['conv3_w'], params['conv3_b'],
                          params['pool3_w'], params['pool3_b'])
    x, w_raw, k3, kl3, _ = cmp_pool(xc, w_raw, score, k2, pooling_ratio)
    x3 = readout(x, num_graphs, k3)

    kl_all = kl1 + kl2 + kl3

    # MLP head (x1+x2+x3 summed in-kernel), regression branch: (x, L1 loss, kl_all, indices_)
    pred, loss = mlp_head(x1, x2, x3, params, label)
    return pred, loss, kl_all, indices_


# --------------------------------- main ------------------------------------

if __name__ == "__main__":
    key = jax.random.PRNGKey(0)
    B, N_PER = 2, 8                       # 2 graphs, 8 nodes each -> N = 16
    NUM_FEATURES, NHID, NUM_CLASSES = 4, 128, 1   # nhid lane-dense (multiple of 128)
    POOLING_RATIO = 0.5

    N = B * N_PER
    k_fea, k_w, k_lab, k_par = jax.random.split(key, 4)
    fea = jax.random.normal(k_fea, (N, NUM_FEATURES), jnp.float32)

    # ring graph inside each component, symmetric edges
    src, dst = [], []
    for g in range(B):
        base = g * N_PER
        for i in range(N_PER):
            j = (i + 1) % N_PER
            src += [base + i, base + j]
            dst += [base + j, base + i]
    adj_index = jnp.array([src, dst], dtype=jnp.int32)
    adj_weight = jnp.abs(jax.random.normal(k_w, (adj_index.shape[1],), jnp.float32)) + 0.1
    batch_index = jnp.repeat(jnp.arange(B, dtype=jnp.int32), N_PER)
    label = jax.random.normal(k_lab, (B, 2), jnp.float32)

    params = init_params(k_par, NUM_FEATURES, NHID, NUM_CLASSES)

    pred, loss, kl_all, indices_ = net_forward(
        params, fea, adj_index, adj_weight, batch_index, label,
        num_graphs=B, n_per_graph=N_PER, pooling_ratio=POOLING_RATIO)
    jax.block_until_ready((pred, loss, kl_all, indices_))
    print("KERNEL_OK")
</pallas_src>

<mosaic_0001>
module attributes {stable_mosaic.version = 11 : i64} {
  func.func @_gcn_block_kernel(%arg0: i32, %arg1: memref<16x16xf32, #tpu.memory_space<vmem>>, %arg2: memref<16x4xf32, #tpu.memory_space<vmem>>, %arg3: memref<4x128xf32, #tpu.memory_space<vmem>>, %arg4: memref<1x128xf32, #tpu.memory_space<vmem>>, %arg5: memref<128x1xf32, #tpu.memory_space<vmem>>, %arg6: memref<1x1xf32, #tpu.memory_space<vmem>>, %arg7: memref<16x128xf32, #tpu.memory_space<vmem>>, %arg8: memref<16x1xf32, #tpu.memory_space<vmem>>) attributes {dimension_semantics = [#tpu.dimension_semantics<arbitrary>], iteration_bounds = array<i64: 1>, scalar_prefetch = 0 : i64, scratch_operands = 0 : i64, tpu.core_type = #tpu.core_type<tc>, window_params = [{pipeline_mode = #tpu.pipeline_mode<synchronous>, transform_indices = @transform_0, window_bounds = array<i64: 16, 16>}, {pipeline_mode = #tpu.pipeline_mode<synchronous>, transform_indices = @transform_1, window_bounds = array<i64: 16, 4>}, {pipeline_mode = #tpu.pipeline_mode<synchronous>, transform_indices = @transform_2, window_bounds = array<i64: 4, 128>}, {pipeline_mode = #tpu.pipeline_mode<synchronous>, transform_indices = @transform_3, window_bounds = array<i64: 1, 128>}, {pipeline_mode = #tpu.pipeline_mode<synchronous>, transform_indices = @transform_4, window_bounds = array<i64: 128, 1>}, {pipeline_mode = #tpu.pipeline_mode<synchronous>, transform_indices = @transform_5, window_bounds = array<i64: 1, 1>}, {pipeline_mode = #tpu.pipeline_mode<synchronous>, transform_indices = @transform_6, window_bounds = array<i64: 16, 128>}, {pipeline_mode = #tpu.pipeline_mode<synchronous>, transform_indices = @transform_7, window_bounds = array<i64: 16, 1>}]} {
    %c0 = arith.constant 0 : index
    %c0_0 = arith.constant 0 : index
    %0 = vector.load %arg1[%c0, %c0_0] : memref<16x16xf32, #tpu.memory_space<vmem>>, vector<16x16xf32>
    %1 = tpu.iota {dimensions = array<i32: 0>} : vector<16x16xi32>
    %2 = tpu.iota {dimensions = array<i32: 1>} : vector<16x16xi32>
    %3 = arith.cmpi eq, %1, %2 : vector<16x16xi32>
    %cst = arith.constant 1.000000e+00 : f32
    %cst_1 = arith.constant 0.000000e+00 : f32
    %4 = vector.broadcast %cst : f32 to vector<16x16xf32>
    %5 = vector.broadcast %cst_1 : f32 to vector<16x16xf32>
    %6 = arith.select %3, %4, %5 : vector<16x16xi1>, vector<16x16xf32>
    %7 = arith.addf %0, %6 : vector<16x16xf32>
    %cst_2 = arith.constant dense<0.000000e+00> : vector<16xf32>
    %8 = vector.multi_reduction <add>, %7, %cst_2 [1] : vector<16x16xf32> to vector<16xf32>
    %9 = vector.shape_cast %8 : vector<16xf32> to vector<16x1xf32>
    %cst_3 = arith.constant dense<0.000000e+00> : vector<16xf32>
    %10 = vector.multi_reduction <add>, %7, %cst_3 [0] : vector<16x16xf32> to vector<16xf32>
    %11 = vector.shape_cast %10 : vector<16xf32> to vector<1x16xf32>
    %cst_4 = arith.constant 0.000000e+00 : f32
    %12 = vector.broadcast %cst_4 : f32 to vector<16x1xf32>
    %13 = arith.cmpf ogt, %9, %12 : vector<16x1xf32>
    %14 = math.rsqrt %9 : vector<16x1xf32>
    %cst_5 = arith.constant 0.000000e+00 : f32
    %15 = vector.broadcast %cst_5 : f32 to vector<16x1xf32>
    %16 = arith.select %13, %14, %15 : vector<16x1xi1>, vector<16x1xf32>
    %cst_6 = arith.constant 0.000000e+00 : f32
    %17 = vector.broadcast %cst_6 : f32 to vector<1x16xf32>
    %18 = arith.cmpf ogt, %11, %17 : vector<1x16xf32>
    %19 = math.rsqrt %11 : vector<1x16xf32>
    %cst_7 = arith.constant 0.000000e+00 : f32
    %20 = vector.broadcast %cst_7 : f32 to vector<1x16xf32>
    %21 = arith.select %18, %19, %20 : vector<1x16xi1>, vector<1x16xf32>
    %22 = vector.broadcast %16 : vector<16x1xf32> to vector<16x16xf32>
    %23 = arith.mulf %7, %22 : vector<16x16xf32>
    %24 = vector.broadcast %21 : vector<1x16xf32> to vector<16x16xf32>
    %25 = arith.mulf %23, %24 : vector<16x16xf32>
    %c0_8 = arith.constant 0 : index
    %c0_9 = arith.constant 0 : index
    %26 = vector.load %arg2[%c0_8, %c0_9] : memref<16x4xf32, #tpu.memory_space<vmem>>, vector<16x4xf32>
    %c0_10 = arith.constant 0 : index
    %c0_11 = arith.constant 0 : index
    %27 = vector.load %arg3[%c0_10, %c0_11] : memref<4x128xf32, #tpu.memory_space<vmem>>, vector<4x128xf32>
    %cst_12 = arith.constant dense<0.000000e+00> : vector<16x128xf32>
    %28 = tpu.matmul %26, %27, %cst_12 {dimension_numbers = #tpu.dot_dimension_numbers<[1], [0], [0], [1], [0, 0, 1, 1], [], []>} : vector<16x4xf32>, vector<4x128xf32>, vector<16x128xf32> -> vector<16x128xf32>
    %cst_13 = arith.constant dense<0.000000e+00> : vector<16x128xf32>
    %29 = tpu.matmul %25, %28, %cst_13 {dimension_numbers = #tpu.dot_dimension_numbers<[1], [0], [0], [1], [0, 0, 1, 1], [], []>} : vector<16x16xf32>, vector<16x128xf32>, vector<16x128xf32> -> vector<16x128xf32>
    %c0_14 = arith.constant 0 : index
    %c0_15 = arith.constant 0 : index
    %30 = vector.load %arg4[%c0_14, %c0_15] : memref<1x128xf32, #tpu.memory_space<vmem>>, vector<1x128xf32>
    %31 = vector.broadcast %30 : vector<1x128xf32> to vector<16x128xf32>
    %32 = arith.addf %29, %31 : vector<16x128xf32>
    %cst_16 = arith.constant 0.000000e+00 : f32
    %33 = vector.broadcast %cst_16 : f32 to vector<16x128xf32>
    %34 = arith.maximumf %32, %33 : vector<16x128xf32>
    %c0_17 = arith.constant 0 : index
    %c0_18 = arith.constant 0 : index
    %35 = vector.load %arg7[%c0_17, %c0_18] : memref<16x128xf32, #tpu.memory_space<vmem>>, vector<16x128xf32>
    tpu.vector_store %arg7[%c0_17, %c0_18], %34 {strides = array<i32>} : memref<16x128xf32, #tpu.memory_space<vmem>>, vector<16x128xf32>,
    %c0_19 = arith.constant 0 : index
    %c0_20 = arith.constant 0 : index
    %36 = vector.load %arg5[%c0_19, %c0_20] : memref<128x1xf32, #tpu.memory_space<vmem>>, vector<128x1xf32>
    %cst_21 = arith.constant dense<0.000000e+00> : vector<16x1xf32>
    %37 = tpu.matmul %34, %36, %cst_21 {dimension_numbers = #tpu.dot_dimension_numbers<[1], [0], [0], [1], [0, 0, 1, 1], [], []>} : vector<16x128xf32>, vector<128x1xf32>, vector<16x1xf32> -> vector<16x1xf32>
    %cst_22 = arith.constant dense<0.000000e+00> : vector<16x1xf32>
    %38 = tpu.matmul %25, %37, %cst_22 {dimension_numbers = #tpu.dot_dimension_numbers<[1], [0], [0], [1], [0, 0, 1, 1], [], []>} : vector<16x16xf32>, vector<16x1xf32>, vector<16x1xf32> -> vector<16x1xf32>
    %c0_23 = arith.constant 0 : index
    %c0_24 = arith.constant 0 : index
    %39 = vector.load %arg6[%c0_23, %c0_24] : memref<1x1xf32, #tpu.memory_space<vmem>>, vector<1x1xf32>
    %40 = vector.broadcast %39 : vector<1x1xf32> to vector<16x1xf32>
    %41 = arith.addf %38, %40 : vector<16x1xf32>
    %c0_25 = arith.constant 0 : index
    %c0_26 = arith.constant 0 : index
    %42 = vector.load %arg8[%c0_25, %c0_26] : memref<16x1xf32, #tpu.memory_space<vmem>>, vector<16x1xf32>
    tpu.vector_store %arg8[%c0_25, %c0_26], %41 {strides = array<i32>} : memref<16x1xf32, #tpu.memory_space<vmem>>, vector<16x1xf32>,
    return
  }
  func.func @transform_0(%arg0: i32) -> (i32, i32) {
    %c0_i32 = arith.constant 0 : i32
    %c0_i32_0 = arith.constant 0 : i32
    %c0_i32_1 = arith.constant 0 : i32
    return %c0_i32, %c0_i32_0 : i32, i32
  }
  func.func @transform_1(%arg0: i32) -> (i32, i32) {
    %c0_i32 = arith.constant 0 : i32
    %c0_i32_0 = arith.constant 0 : i32
    %c0_i32_1 = arith.constant 0 : i32
    return %c0_i32, %c0_i32_0 : i32, i32
  }
  func.func @transform_2(%arg0: i32) -> (i32, i32) {
    %c0_i32 = arith.constant 0 : i32
    %c0_i32_0 = arith.constant 0 : i32
    %c0_i32_1 = arith.constant 0 : i32
    return %c0_i32, %c0_i32_0 : i32, i32
  }
  func.func @transform_3(%arg0: i32) -> (i32, i32) {
    %c0_i32 = arith.constant 0 : i32
    %c0_i32_0 = arith.constant 0 : i32
    %c0_i32_1 = arith.constant 0 : i32
    return %c0_i32, %c0_i32_0 : i32, i32
  }
  func.func @transform_4(%arg0: i32) -> (i32, i32) {
    %c0_i32 = arith.constant 0 : i32
    %c0_i32_0 = arith.constant 0 : i32
    %c0_i32_1 = arith.constant 0 : i32
    return %c0_i32, %c0_i32_0 : i32, i32
  }
  func.func @transform_5(%arg0: i32) -> (i32, i32) {
    %c0_i32 = arith.constant 0 : i32
    %c0_i32_0 = arith.constant 0 : i32
    %c0_i32_1 = arith.constant 0 : i32
    return %c0_i32, %c0_i32_0 : i32, i32
  }
  func.func @transform_6(%arg0: i32) -> (i32, i32) {
    %c0_i32 = arith.constant 0 : i32
    %c0_i32_0 = arith.constant 0 : i32
    %c0_i32_1 = arith.constant 0 : i32
    return %c0_i32, %c0_i32_0 : i32, i32
  }
  func.func @transform_7(%arg0: i32) -> (i32, i32) {
    %c0_i32 = arith.constant 0 : i32
    %c0_i32_0 = arith.constant 0 : i32
    %c0_i32_1 = arith.constant 0 : i32
    return %c0_i32, %c0_i32_0 : i32, i32
  }
}

</mosaic_0001>

<bundles_post_ra>
// kernel: tpu_custom_call.1
= control target key start
LH: loop header
LB: loop body
LE: loop exit
PB: predicated region body
PF: predicated region fallthrough
CT: control target
= control target key end

     0   :  { %s752_s0 = inlined_call_operand.vmem [shape: f32[16,16], index: 0, kind: input, shape index: {}]   ;;  %s753_s1 = inlined_call_operand.vmem [shape: f32[16,4], index: 1, kind: input, shape index: {}]   ;;  %s754_s2 = inlined_call_operand.vmem [shape: f32[4,128], index: 2, kind: input, shape index: {}]   ;;  %s755_s3 = inlined_call_operand.vmem [shape: f32[1,128], index: 3, kind: input, shape index: {}]   ;;  %s756_s4 = inlined_call_operand.vmem [shape: f32[128,1], index: 4, kind: input, shape index: {}]   ;;  %s757_s5 = inlined_call_operand.<no memory space> [shape: f32[1,1], index: 5, kind: input, shape index: {}]   ;;  %s758_s6 = inlined_call_operand.hbm [shape: f32[16,128], index: 6, kind: output, shape index: {0}]   ;;  %s759_s7 = inlined_call_operand.vmem [shape: f32[16,1], index: 7, kind: output, shape index: {1}]  }
   0x1   :  { %v13_v0 = vstv %s757_s5 }
   0x2   :  { %14 = vst [vmem:[#allocation2] sm:$0x1] %v13_v0 }
   0x3   :  { %v70_v1 = vld [vmem:[%s754_s2] sm:$0xf]  ;;  %vm78_vm0 = vcmask 1043456   ;;  %vm71_vm1 = vcmask 31744   ;;  %v69_v3 = vld [vmem:[%s753_s1 + $0x8] sm:$0xff]  ;;  %v30_v4 = vlaneseq }
   0x4   :  { %v68_v2 = vld [vmem:[%s753_s1] sm:$0xff]  ;;  %483 = vmatprep.subr.msk.mxu1 %vm78_vm0, %v70_v1 }
   0x5   :  { %485 = vmatprep.mubr.msk.f32.mxu1 %vm71_vm1, %v68_v2 }
   0x6   :  { %15 = vsyncpa [#allocation4], 0  ;;  %484 = vmatpush3.msk.msra.mxu1 %vm78_vm0, %v70_v1  ;;  %v31_v5 = vshrl.u32 %v30_v4, 7  ;;  %v34_v6 = vand.u32 127, %v30_v4  ;;  %v28_v7 = vld [vmem:[%s752_s0] sm:$0xff]  ;;  %v611_v9 = vmov 0.0  }
   0x7   :  { %486 = vmatmul.mubr.msk.f32.vlgmr.msra.gmra.mrb[0].mxu1 %vm71_vm1, %v69_v3  ;;  %vm41_vm3 = vcmask 130048   ;;  %v29_v11 = vld [vmem:[%s752_s0 + $0x8] sm:$0xff]  ;;  %v249_v18 = vld [vmem:[%s756_s4] sm:$0xff]  ;;  %v251_v20 = vld [vmem:[%s756_s4 + $0x10] sm:$0xff] }
   0x8   :  { %vm35_vm2 = vcmp.eq.s32.totalorder %v31_v5, %v34_v6  ;;  %v32_v8 = vadd.s32 8, %v31_v5  ;;  %v250_v19 = vld [vmem:[%s756_s4 + $0x8] sm:$0xff]  ;;  %v252_v22 = vld [vmem:[%s756_s4 + $0x18] sm:$0xff]  ;;  %v253_v24 = vld [vmem:[%s756_s4 + $0x20] sm:$0xff] }
   0x9   :  { %v37_v10 = vsel %vm35_vm2, 1.0, %v611_v9  ;;  %v541_v21 = vpack.c.bf16 %v250_v19, %v249_v18  ;;  %v545_v23 = vpack.c.bf16 %v252_v22, %v251_v20  ;;  %v254_v25 = vld [vmem:[%s756_s4 + $0x28] sm:$0xff]  ;;  %v255_v27 = vld [vmem:[%s756_s4 + $0x30] sm:$0xff]  ;;  %v256_v28 = vld [vmem:[%s756_s4 + $0x38] sm:$0xff] }
   0xa   :  { %v39_v12 = vadd.f32 %v37_v10, %v28_v7  ;;  %vm36_vm4 = vcmp.eq.s32.totalorder %v32_v8, %v34_v6  ;;  %v549_v26 = vpack.c.bf16 %v254_v25, %v253_v24  ;;  %v553_v29 = vpack.c.bf16 %v256_v28, %v255_v27  ;;  %v257_v30 = vld [vmem:[%s756_s4 + $0x40] sm:$0xff]  ;;  %v258_v31 = vld [vmem:[%s756_s4 + $0x48] sm:$0xff]  ;;  %v259_v33 = vld [vmem:[%s756_s4 + $0x50] sm:$0xff] }
   0xb   :  { %v38_v13 = vsel %vm36_vm4, 1.0, %v611_v9  ;;  %542 = vmatprep.subr.bf16.mxu0 %v541_v21  ;;  %v557_v32 = vpack.c.bf16 %v258_v31, %v257_v30  ;;  %v260_v34 = vld [vmem:[%s756_s4 + $0x58] sm:$0xff]  ;;  %v261_v36 = vld [vmem:[%s756_s4 + $0x60] sm:$0xff]  ;;  %v262_v37 = vld [vmem:[%s756_s4 + $0x68] sm:$0xff] }
   0xc   :  { %v42_v14 = vsel %vm41_vm3, %v39_v12, 0.0  ;;  %v674_v15 = vadd.f32 %v38_v13, %v29_v11  ;;  %544 = vmatpush3.bf16.msra.mxu0 %v541_v21  ;;  %v561_v35 = vpack.c.bf16 %v260_v34, %v259_v33  ;;  %v565_v38 = vpack.c.bf16 %v262_v37, %v261_v36  ;;  %v263_v60 = vld [vmem:[%s756_s4 + $0x70] sm:$0xff]  ;;  %v264_v61 = vld [vmem:[%s756_s4 + $0x78] sm:$0xff]  ;;  %v448_v63 = vld [vmem:[%s755_s3] ss:$0 sm:$0xff]  ;;  %s612_s4 = smov [#allocation3]  }
   0xd   :  { %43 = vadd.xlane.f32.xlu0 %v42_v14  ;;  %546 = vmatprep.subr.bf16.mxu0 %v545_v23  ;;  %v569_v62 = vpack.c.bf16 %v264_v61, %v263_v60  ;;  %s430_s16 = sshll.u32 %s612_s4, 4  ;;  %s431_s16 = int_to_ptr.vmem [resolvable:$true] %s430_s16 }
   0xe   :  { %v45_v16 = vsel %vm41_vm3, %v674_v15, 0.0  ;;  %s587_s3 = scalar_lea.vmem %s431_s16, 256  ;;  %p592_p1 = scmp.lt.s32.totalorder %s431_s16, %s431_s16 }
   0xf   :  { %v48_v17 = vadd.f32 %v45_v16, %v42_v14  ;;  %p588_p0 = scmp.ne.s32.totalorder %s431_s16, %s587_s3  ;;  %p593_p2 = scmp.lt.s32.totalorder %s587_s3, %s587_s3 }
  0x10   :  { %548 = vmatpush3.bf16.msra.mxu0 %v545_v23 }
  0x11   :  { %46 = vadd.xlane.f32.xlu0 %v45_v16  ;;  %550 = vmatprep.subr.bf16.mxu0 %v549_v26  ;;  %v49_v39 = vrot.slane %v48_v17, 4  ;;  %p594_p3 = por %p593_p2, %p592_p1 }
  0x13   :  { %v50_v40 = vadd.f32 %v49_v39, %v48_v17  ;;  %p595_p4 = pnand %p594_p3, %p588_p0 }
  0x14   :  { %552 = vmatpush3.bf16.msra.mxu0 %v549_v26 }
  0x15   :  { %554 = vmatprep.subr.bf16.mxu0 %v553_v29  ;;  %v51_v41 = vrot.slane %v50_v40, 2 }
  0x17   :  { %v52_v42 = vadd.f32 %v51_v41, %v50_v40 }
  0x18   :  { %556 = vmatpush3.bf16.msra.mxu0 %v553_v29 }
  0x19   :  { %558 = vmatprep.subr.bf16.mxu0 %v557_v32  ;;  %v53_v43 = vrot.slane %v52_v42, 1 }
  0x1b   :  { %v54_v44 = vadd.f32 %v53_v43, %v52_v42 }
  0x1c   :  { %560 = vmatpush3.bf16.msra.mxu0 %v557_v32 }
  0x1d   :  { %562 = vmatprep.subr.bf16.mxu0 %v561_v35  ;;  %581 = vrsqrt.f32 %v54_v44  ;;  %vm61_vm6 = vcmp.gt.f32.partialorder %v54_v44, 0.0 }
  0x20   :  { %564 = vmatpush3.bf16.msra.mxu0 %v561_v35 }
  0x21   :  { %566 = vmatprep.subr.bf16.mxu0 %v565_v38 }
  0x24   :  { %568 = vmatpush3.bf16.msra.mxu0 %v565_v38 }
  0x25   :  { %570 = vmatprep.subr.bf16.mxu0 %v569_v62 }
  0x27   :  { %v582_v46 = vpop.eup %581 }
  0x28   :  { %v63_v49 = vsel %vm61_vm6, %v582_v46, 0.0  ;;  %572 = vmatpush3.bf16.msra.mxu0 %v569_v62 }
  0x9a   :  { %v44_v45 = vpop.xlane.xlu0 %43 }
  0x9b   :  { %583 = vrsqrt.f32 %v44_v45  ;;  %vm55_vm5 = vcmp.gt.f32.partialorder %v44_v45, 0.0 }
  0x9e   :  { %v47_v52 = vpop.xlane.xlu0 %46 }
  0x9f   :  { %585 = vrsqrt.f32 %v47_v52  ;;  %vm56_vm7 = vcmp.gt.f32.partialorder %v47_v52, 0.0 }
  0xa5   :  { %v584_v47 = vpop.eup %583 }
  0xa6   :  { %v59_v48 = vsel %vm55_vm5, %v584_v47, 0.0 }
  0xa7   :  { %v64_v50 = vmul.f32 %v59_v48, %v39_v12 }
  0xa9   :  { %v66_v51 = vmul.f32 %v64_v50, %v63_v49  ;;  %v586_v53 = vpop.eup %585 }
  0xaa   :  { %v60_v54 = vsel %vm56_vm7, %v586_v53, 0.0 }
  0xab   :  { %492 = vmatprep.mubr.msk.f32.mxu1 %vm41_vm3, %v66_v51  ;;  %v65_v57 = vmul.f32 %v60_v54, %v674_v15 }
  0xad   :  { %v67_v59 = vmul.f32 %v65_v57, %v63_v49 }
  0xda   :  { %v487_v55 = vpop.f32.mrb[0].mxu1 }
  0xdb   :  { %v148_v56 = vpop.f32.mrb[1].mxu1 }
  0xdc   :  { %v537_v58 = vpack.c.bf16 %v487_v55, %v148_v56 }
  0xde   :  { %538 = vmatprep.subr.bf16.mxu1 %v537_v58 }
  0xdf   :  { %540 = vmatpush3.bf16.msra.mxu1 %v537_v58 }
  0xe2   :  { %493 = vmatmul.mubr.msk.f32.vlgmr.msra.gmra.mrb[2].mxu1 %vm41_vm3, %v67_v59 }
  0xe3   :  { %534 = vmatprep.mubr.msk.f32.mxu1 %vm41_vm3, %v66_v51 }
 0x1b5   :  { %v494_v0 = vpop.f32.mrb[2].mxu1 }
 0x1b6   :  { %v242_v1 = vadd.f32 %v494_v0, %v448_v63  ;;  %v236_v2 = vpop.f32.mrb[3].mxu1 }
 0x1b7   :  { %v237_v3 = vadd.f32 %v448_v63, %v236_v2 }
 0x1b8   :  { %v246_v4 = vmax.f32 %v242_v1, 0.0 }
 0x1b9   :  { %v245_v5 = vmax.f32 %v237_v3, 0.0 }
 0x1ba   :  { %248 = vst [vmem:[#allocation3 + $0x8] sm:$0xff] %v246_v4 }
 0x1bb   :  { %247 = vst [vmem:[#allocation3] sm:$0xff] %v245_v5  ;;  %527 = vmatprep.mubr.f32.mxu0 %v245_v5 }
 0x1bc   :  { %528 = vmatmul.mubr.f32.vlgmr.msra.gmra.mrb[0].mxu0 %v246_v4 }
 0x28f   :  { %v529_v6 = vpop.f32.mrb[0].mxu0 }
 0x290   :  { %v331_v7 = vpop.f32.mrb[1].mxu0 }
 0x291   :  { %v573_v8 = vpack.c.bf16 %v529_v6, %v331_v7 }
 0x293   :  { %574 = vmatprep.subr.bf16.mxu1 %v573_v8 }
 0x294   :  { %576 = vmatpush3.bf16.msra.mxu1 %v573_v8 }
 0x297   :  { %535 = vmatmul.mubr.msk.f32.vlgmr.msra.gmra.mrb[4].mxu1 %vm41_vm3, %v67_v59 }
 0x298   :  { %598 = shalt.err (!%p595_p4)
}
 0x299   :  { %s599_s19 = scalar_lea.hbm %s758_s6, 256 }
 0x29a   :  { %p600_p5 = scmp.ne.s32.totalorder %s758_s6, %s599_s19  ;;  %p603_p6 = scmp.lt.u32.totalorder %s599_s19, %s758_s6 }
 0x29c   :  { %p605_p7 = pnand %p603_p6, %p600_p5 }
 0x29e   :  { %608 = shalt.err (!%p605_p7)
}
 0x29f   :  { %s613_s24 = smov 128   ;;  %s614_s25 = smov 8   ;;  %v451_v9 = vld [vmem:[#allocation2] ss:$0 sm:$0xff]  ;;  %vm422_vm8 = vcmask 7168  }
 0x2a0   :  { %436 = dma.vmem_to_hbm [thread:$0]  %s431_s16, 256, %s758_s6, [#allocation4], %s613_s24, %s613_s24, %s614_s25  }
 0x36a   :  { %v536_v10 = vpop.f32.mrb[4].mxu1 }
 0x36b   :  { %v419_v11 = vadd.f32 %v536_v10, %v451_v9  ;;  %v413_v12 = vpop.f32.mrb[5].mxu1 }
 0x36c   :  { %v414_v13 = vadd.f32 %v451_v9, %v413_v12 }
 0x36d   :  { %424 = vst.msk [vmem:[%s759_s7 + $0x8] sm:$0xff] %vm422_vm8, %v419_v11 }
 0x36e   :  { %423 = vst.msk [vmem:[%s759_s7] sm:$0xff] %vm422_vm8, %v414_v13 }
 0x36f   :  { %609 = dma.done.wait [#allocation4], 256  }
 0x370   :  { %610 = vsyncadd [#allocation4], 4294967040 }
 0x371   :  { %444 = vsyncpa [#allocation4], 1 }

</bundles_post_ra>
